<compile_context>
chip_gen: v7x
topology: tpu7x:2x2x1
jax: 0.10.0
libtpu: 0.0.40
codegen_flags: <defaults>
</compile_context>

<pallas_src>
import jax
import jax.numpy as jnp
from jax.experimental import pallas as pl
from jax.experimental.pallas import tpu as pltpu


def _swish_kernel(x_ref, o_ref):
    # swish(x) = x * sigmoid(x).  Compute in f32 (required on v5e: no bf16
    # VPU/EUP); exp and the exact reciprocal both ride the EUP path, keeping
    # the kernel purely HBM-bandwidth bound.
    xf = x_ref[...].astype(jnp.float32)
    sig = pl.reciprocal(1.0 + jnp.exp(-xf))  # approx=False -> exact (1e-6 tol)
    o_ref[...] = (xf * sig).astype(o_ref.dtype)


def _round_up(n: int, m: int) -> int:
    return ((n + m - 1) // m) * m


def _round_down(n: int, m: int) -> int:
    return (n // m) * m


_LANE_CANDIDATES = (4096, 2048, 1024, 512, 256, 128)


def _pick_lane(n: int, sublane: int):
    """Largest candidate lane dividing n (prefer rows >= sublane); None if 128 does not divide n."""
    fallback = None
    for lane in _LANE_CANDIDATES:
        if n % lane == 0:
            if fallback is None:
                fallback = lane
            if n // lane >= sublane:
                return lane
    return fallback


def _pick_tile_rows(rows: int, lane: int, itemsize: int, sublane: int) -> int:
    bytes_per_row = lane * itemsize
    total_bytes = rows * bytes_per_row
    block_budget = 4 * 1024 * 1024   # ~4 MiB blocks sit at ~85%+ of HBM roofline
    min_block = 2 * 1024 * 1024      # never shrink below ~2 MiB for step-depth

    tile_rows = max(sublane, _round_down(block_budget // bytes_per_row, sublane))

    # Pipeline / megacore depth: >=8 steps for >=8 MiB inputs (>=4 per v7x TC),
    # >=2 steps for mid-size inputs, but keep blocks >= ~2 MiB.
    if total_bytes >= 8 * 1024 * 1024:
        target_steps = 8
    elif total_bytes >= 2 * min_block:
        target_steps = 2
    else:
        target_steps = 1
    if target_steps > 1:
        per_step = max(sublane, _round_up(pl.cdiv(rows, target_steps), sublane))
        floor_rows = max(sublane, _round_down(min_block // bytes_per_row, sublane))
        tile_rows = min(tile_rows, max(per_step, floor_rows))

    return max(1, min(tile_rows, rows))


def _swish_2d(x2d: jax.Array, tile_rows: int, lane: int) -> jax.Array:
    rows = x2d.shape[0]
    grid = (pl.cdiv(rows, tile_rows),)  # ragged last block is masked by Pallas
    return pl.pallas_call(
        _swish_kernel,
        out_shape=jax.ShapeDtypeStruct(x2d.shape, x2d.dtype),
        grid_spec=pltpu.PrefetchScalarGridSpec(
            num_scalar_prefetch=0,
            grid=grid,
            in_specs=[pl.BlockSpec((tile_rows, lane), lambda i: (i, 0))],
            out_specs=pl.BlockSpec((tile_rows, lane), lambda i: (i, 0)),
        ),
        compiler_params=pltpu.CompilerParams(
            dimension_semantics=("parallel",),
            # 2 buffers x (in + out) x <=4 MiB blocks = <=16 MiB << 32 MiB
            # scoped limit on every generation (incl. v7x's 64 MiB VMEM).
            vmem_limit_bytes=32 * 1024 * 1024,
        ),
    )(x2d)


def swish(x: jax.Array, *, min_pallas_elems: int = 65536) -> jax.Array:
    """Elementwise Swish (x * sigmoid(x)); hot path runs in Pallas."""
    orig_shape = x.shape
    n = x.size
    if n == 0:
        return x
    if n < min_pallas_elems:
        # pallas_call launch + reshape plumbing dominates tiny inputs; an
        # XLA-fused elementwise op is strictly faster here.
        xf = x.astype(jnp.float32)
        return (xf * jax.nn.sigmoid(xf)).astype(x.dtype)

    itemsize = jnp.dtype(x.dtype).itemsize
    sublane = max(8, 32 // itemsize)  # 8 for 4-byte, 16 for bf16/fp16, 32 for int8/fp8

    x_flat = jnp.ravel(x)             # free (row-major) reshape
    lane = _pick_lane(n, sublane)
    if lane is not None:
        # Common path: n divisible by a lane width -> no pad / output slice.
        rows = n // lane
        tile_rows = _pick_tile_rows(rows, lane, itemsize, sublane)
        out2d = _swish_2d(x_flat.reshape(rows, lane), tile_rows, lane)
        return out2d.reshape(orig_shape)

    # Rare fallback: n not a multiple of 128 -> pad by one small quantum only.
    quantum = sublane * 128
    n_pad = _round_up(n, quantum)
    x_flat = jnp.pad(x_flat, (0, n_pad - n))
    lane = _pick_lane(n_pad, sublane)
    rows = n_pad // lane
    tile_rows = _pick_tile_rows(rows, lane, itemsize, sublane)
    out2d = _swish_2d(x_flat.reshape(rows, lane), tile_rows, lane)
    return out2d.reshape(n_pad)[:n].reshape(orig_shape)


if __name__ == "__main__":
    key = jax.random.PRNGKey(0)
    # NCHW-shaped input, same as what a PyTorch conv pipeline would feed Swish.
    x = jax.random.normal(key, (2, 4, 16, 16), dtype=jnp.float32)

    # Force the Pallas path (default would use the small-input jnp fallback).
    out = jax.block_until_ready(swish(x, min_pallas_elems=0))
    ref = x * jax.nn.sigmoid(x)
    assert out.shape == x.shape and out.dtype == x.dtype
    assert jnp.allclose(out, ref, atol=1e-6, rtol=1e-6)

    # Ragged, non-128-divisible shape exercises the pad-fallback path.
    x2 = jax.random.normal(jax.random.PRNGKey(1), (3, 5, 33, 17), dtype=jnp.float32)
    out2 = jax.block_until_ready(swish(x2, min_pallas_elems=0))
    ref2 = x2 * jax.nn.sigmoid(x2)
    assert out2.shape == x2.shape and jnp.allclose(out2, ref2, atol=1e-6, rtol=1e-6)

    # bf16 path exercises the dtype-aware (16, 128) packed-tile sizing.
    x3 = jax.random.normal(jax.random.PRNGKey(2), (2, 8, 32, 128), dtype=jnp.bfloat16)
    out3 = jax.block_until_ready(swish(x3, min_pallas_elems=0))
    x3f = x3.astype(jnp.float32)
    ref3 = (x3f * jax.nn.sigmoid(x3f)).astype(jnp.bfloat16)
    assert out3.shape == x3.shape and out3.dtype == x3.dtype
    assert jnp.allclose(out3.astype(jnp.float32), ref3.astype(jnp.float32),
                        atol=1e-2, rtol=1e-2)

    # Default behaviour on a small input (plain-jnp fallback) still matches.
    out4 = jax.block_until_ready(swish(x))
    assert jnp.allclose(out4, ref, atol=1e-6, rtol=1e-6)

    print("KERNEL_OK")
</pallas_src>

<mosaic_0001>
module attributes {stable_mosaic.version = 11 : i64} {
  func.func @_swish_kernel(%arg0: i32, %arg1: memref<8x256xf32, #tpu.memory_space<vmem>>, %arg2: memref<8x256xf32, #tpu.memory_space<vmem>>) attributes {dimension_semantics = [#tpu.dimension_semantics<parallel>], iteration_bounds = array<i64: 1>, scalar_prefetch = 0 : i64, scratch_operands = 0 : i64, tpu.core_type = #tpu.core_type<tc>, window_params = [{transform_indices = @transform_0, window_bounds = array<i64: 8, 256>}, {transform_indices = @transform_1, window_bounds = array<i64: 8, 256>}]} {
    %c0 = arith.constant 0 : index
    %c0_0 = arith.constant 0 : index
    %0 = vector.load %arg1[%c0, %c0_0] : memref<8x256xf32, #tpu.memory_space<vmem>>, vector<8x256xf32>
    %cst = arith.constant 0.000000e+00 : f32
    %1 = vector.broadcast %cst : f32 to vector<8x256xf32>
    %2 = arith.subf %1, %0 : vector<8x256xf32>
    %3 = math.exp %2 : vector<8x256xf32>
    %cst_1 = arith.constant 1.000000e+00 : f32
    %4 = vector.broadcast %cst_1 : f32 to vector<8x256xf32>
    %5 = arith.addf %4, %3 : vector<8x256xf32>
    %6 = tpu.reciprocal %5 : vector<8x256xf32> -> vector<8x256xf32>
    %7 = arith.mulf %0, %6 : vector<8x256xf32>
    %c0_2 = arith.constant 0 : index
    %c0_3 = arith.constant 0 : index
    %8 = vector.load %arg2[%c0_2, %c0_3] : memref<8x256xf32, #tpu.memory_space<vmem>>, vector<8x256xf32>
    tpu.vector_store %arg2[%c0_2, %c0_3], %7 {strides = array<i32>} : memref<8x256xf32, #tpu.memory_space<vmem>>, vector<8x256xf32>,
    return
  }
  func.func @transform_0(%arg0: i32) -> (i32, i32) {
    %c0_i32 = arith.constant 0 : i32
    %c0_i32_0 = arith.constant 0 : i32
    return %arg0, %c0_i32 : i32, i32
  }
  func.func @transform_1(%arg0: i32) -> (i32, i32) {
    %c0_i32 = arith.constant 0 : i32
    %c0_i32_0 = arith.constant 0 : i32
    return %arg0, %c0_i32 : i32, i32
  }
}

</mosaic_0001>

<bundles_post_ra>
// kernel: tpu_custom_call.1
= control target key start
LH: loop header
LB: loop body
LE: loop exit
PB: predicated region body
PF: predicated region fallthrough
CT: control target
= control target key end

     0   :  { %6 = vsyncpa [#allocation3], 0  ;;  %s146_s0 = inlined_call_operand.hbm [shape: f32[8,256], index: 0, kind: input, shape index: {}]   ;;  %s147_s1 = inlined_call_operand.hbm [shape: f32[8,256], index: 1, kind: output, shape index: {}]  }
   0x1   :  { %7 = vsyncpa [#allocation4], 0  ;;  %s110_s6 = smov [#allocation2]   ;;  %s62_s10 = scalar_lea.hbm %s146_s0, 256 }
   0x2   :  { %s14_s7 = sshll.u32 %s110_s6, 4  ;;  %p63_p0 = scmp.ne.s32.totalorder %s146_s0, %s62_s10  ;;  %s15_s7 = int_to_ptr.vmem [resolvable:$true] %s14_s7 }
   0x3   :  { %p66_p1 = scmp.lt.u32.totalorder %s62_s10, %s146_s0 }
   0x5   :  { %p68_p2 = pnand %p66_p1, %p63_p0 }
   0x7   :  { %71 = shalt.err (!%p68_p2)
}
   0x8   :  { %s72_s15 = scalar_lea.vmem %s15_s7, 256  ;;  %p77_p4 = scmp.lt.s32.totalorder %s15_s7, %s15_s7 }
   0x9   :  { %p73_p3 = scmp.ne.s32.totalorder %s15_s7, %s72_s15  ;;  %p78_p5 = scmp.lt.s32.totalorder %s72_s15, %s72_s15 }
   0xb   :  { %p79_p6 = por %p78_p5, %p77_p4 }
   0xd   :  { %p80_p7 = pnand %p79_p6, %p73_p3 }
   0xf   :  { %83 = shalt.err (!%p80_p7)
}
  0x10   :  { %17 = dma.hbm_to_vmem [thread:$0]  %s146_s0, 256, %s15_s7, [#allocation3]  }
  0x11   :  { %106 = dma.done.wait [#allocation3], 256  }
  0x12   :  { %107 = vsyncadd [#allocation3], 4294967040  ;;  %v21_v0 = vld [vmem:[#allocation2] sm:$0xff]  ;;  %v22_v1 = vld [vmem:[#allocation2 + $0x8] sm:$0xff]  ;;  %s111_s18 = smov [#allocation5]  }
  0x13   :  { %v23_v2 = vsub.f32 0.0, %v21_v0  ;;  %v24_v3 = vsub.f32 0.0, %v22_v1  ;;  %s43_s19 = sshll.u32 %s111_s18, 4  ;;  %s44_s19 = int_to_ptr.vmem [resolvable:$true] %s43_s19 }
  0x14   :  { %s84_s0 = scalar_lea.vmem %s44_s19, 256  ;;  %p89_p9 = scmp.lt.s32.totalorder %s44_s19, %s44_s19 }
  0x15   :  { %v25_v4 = vmul.f32 1.442695, %v23_v2  ;;  %v27_v5 = vmul.f32 1.442695, %v24_v3  ;;  %p85_p8 = scmp.ne.s32.totalorder %s44_s19, %s84_s0  ;;  %p90_p10 = scmp.lt.s32.totalorder %s84_s0, %s84_s0 }
  0x17   :  { %54 = vpow2.f32 %v25_v4  ;;  %p91_p11 = por %p90_p10, %p89_p9 }
  0x18   :  { %56 = vpow2.f32 %v27_v5 }
  0x19   :  { %p92_p12 = pnand %p91_p11, %p85_p8 }
  0x21   :  { %v55_v6 = vpop.eup %54 }
  0x22   :  { %v57_v7 = vpop.eup %56  ;;  %v29_v8 = vadd.f32 1.0, %v55_v6 }
  0x23   :  { %v30_v9 = vadd.f32 1.0, %v57_v7 }
  0x24   :  { %58 = vrcp.f32 %v29_v8 }
  0x25   :  { %60 = vrcp.f32 %v30_v9 }
  0x2e   :  { %v59_v10 = vpop.eup %58 }
  0x2f   :  { %v61_v11 = vpop.eup %60  ;;  %v33_v12 = vmul.f32 %v59_v10, %v21_v0 }
  0x30   :  { %v34_v13 = vmul.f32 %v61_v11, %v22_v1 }
  0x31   :  { %35 = vst [vmem:[#allocation5] sm:$0xff] %v33_v12 }
  0x32   :  { %36 = vst [vmem:[#allocation5 + $0x8] sm:$0xff] %v34_v13 }
  0x33   :  { %95 = shalt.err (!%p92_p12)
}
  0x34   :  { %s96_s22 = scalar_lea.hbm %s147_s1, 256 }
  0x35   :  { %p97_p13 = scmp.ne.s32.totalorder %s147_s1, %s96_s22  ;;  %p100_p0 = scmp.lt.u32.totalorder %s96_s22, %s147_s1 }
  0x37   :  { %p102_p1 = pnand %p100_p0, %p97_p13 }
  0x39   :  { %105 = shalt.err (!%p102_p1)
}
  0x3a   :  { %46 = dma.vmem_to_hbm [thread:$0]  %s44_s19, 256, %s147_s1, [#allocation4]  }
  0x3b   :  { %108 = dma.done.wait [#allocation4], 256  }
  0x3c   :  { %109 = vsyncadd [#allocation4], 4294967040 }
  0x3d   :  { %50 = vsyncpa [#allocation3], 1 }
  0x3e   :  { %51 = vsyncpa [#allocation4], 1 }

</bundles_post_ra>
